<compile_context>
chip_gen: v7x
topology: tpu7x:2x2x1
jax: 0.10.0
libtpu: 0.0.40
codegen_flags: <defaults>
</compile_context>

<pallas_src>
import jax
import jax.numpy as jnp
from jax.experimental import pallas as pl
from jax.experimental.pallas import tpu as pltpu

ALPHA = 0.25          # self.alpha = [alpha, 1 - alpha]
GAMMA = 2             # focusing parameter (integer power -> plain VPU multiplies)
POS_WEIGHT = 2.0      # pos_weight=torch.tensor(2) in the BCE call

NUM_SHARDS = 2        # leading "parallel" grid axis (both TCs on v7x; harmless on v5e/v6e)
MAX_TILE_ROWS = 2048  # (2048, 128) f32 tile = 1 MiB per pipeline buffer


def _cdiv(a, b):
    return -(-a // b)


def _round_up(a, m):
    return ((a + m - 1) // m) * m


def _make_kernel(tile_rows, tiles_per_shard, n_valid, needs_mask):
    def kernel(x_ref, t_ref, out_ref):
        i = pl.program_id(1)

        # The output block index depends only on the shard axis, so it stays
        # resident across the reduction axis -> use it as the accumulator.
        @pl.when(i == 0)
        def _():
            out_ref[...] = jnp.zeros_like(out_ref)

        x = x_ref[...].astype(jnp.float32)
        t = t_ref[...].astype(jnp.float32)

        # Numerically stable BCE-with-logits, pos_weight on the positive term:
        #   bce = pos_weight * t * softplus(-x) + (1 - t) * softplus(x)
        # softplus(x) = softplus(-x) + x  -> one logaddexp (exp + log1p) instead of two.
        sp_neg = jnp.logaddexp(-x, 0.0)      # softplus(-x) = -log(sigmoid(x))
        sp_pos = sp_neg + x                  # softplus(x)  = -log(1 - sigmoid(x))
        bce = POS_WEIGHT * t * sp_neg + (1.0 - t) * sp_pos

        # at = alpha.gather(0, targets): alpha[0] where t==0, alpha[1] where t==1.
        at = ALPHA + (1.0 - 2.0 * ALPHA) * t

        pt = jnp.exp(-bce)                   # matches the PyTorch quirk (pos_weight inside exp)
        one_m_pt = 1.0 - pt
        f_loss = at * (one_m_pt * one_m_pt) * bce   # gamma == 2

        if needs_mask:
            shard = pl.program_id(0)
            row0 = (shard * tiles_per_shard + i) * tile_rows
            rows = jax.lax.broadcasted_iota(jnp.int32, f_loss.shape, 0) + row0
            cols = jax.lax.broadcasted_iota(jnp.int32, f_loss.shape, 1)
            flat = rows * 128 + cols
            f_loss = jnp.where(flat < n_valid, f_loss, 0.0)

        # Per-step partial sum: collapse row groups onto the (8,128) accumulator.
        # Pure VALU adds across vregs — no cross-lane/sublane XLU work per step.
        out_ref[...] += f_loss.reshape(tile_rows // 8, 8, 128).sum(axis=0, keepdims=True)

    return kernel


def weighted_focal_loss(inputs, targets):
    """inputs: (N,) logits, targets: (N,) binary labels. Returns scalar mean focal loss (f32)."""
    n = inputs.shape[0]
    rows = _cdiv(n, 128)
    rows_per_shard = _cdiv(rows, NUM_SHARDS)
    tile_rows = min(MAX_TILE_ROWS, _round_up(rows_per_shard, 32))  # multiple of 32: ok for f32/bf16/int8 tiling
    tiles_per_shard = _cdiv(rows_per_shard, tile_rows)
    padded_rows = NUM_SHARDS * tiles_per_shard * tile_rows
    padded_n = padded_rows * 128
    needs_mask = padded_n != n

    # Stream in native dtype (bf16 halves HBM traffic on mem-bound v5e/v6e);
    # the kernel upcasts to f32 for the math.
    x2 = jnp.pad(inputs, (0, padded_n - n)).reshape(padded_rows, 128)
    t2 = jnp.pad(targets, (0, padded_n - n)).reshape(padded_rows, 128)

    cost = pl.CostEstimate(
        flops=16 * padded_n,
        transcendentals=3 * padded_n,
        bytes_accessed=int(x2.size) * x2.dtype.itemsize
        + int(t2.size) * t2.dtype.itemsize
        + NUM_SHARDS * 8 * 128 * 4,
    )

    partials = pl.pallas_call(
        _make_kernel(tile_rows, tiles_per_shard, n, needs_mask),
        out_shape=jax.ShapeDtypeStruct((NUM_SHARDS, 8, 128), jnp.float32),
        grid_spec=pltpu.PrefetchScalarGridSpec(
            num_scalar_prefetch=0,
            grid=(NUM_SHARDS, tiles_per_shard),
            in_specs=[
                pl.BlockSpec((tile_rows, 128), lambda s, i: (s * tiles_per_shard + i, 0)),
                pl.BlockSpec((tile_rows, 128), lambda s, i: (s * tiles_per_shard + i, 0)),
            ],
            out_specs=pl.BlockSpec((1, 8, 128), lambda s, i: (s, 0, 0)),
        ),
        compiler_params=pltpu.CompilerParams(
            dimension_semantics=("parallel", "arbitrary"),
        ),
        cost_estimate=cost,
    )(x2, t2)

    # Final cross-lane/sublane + cross-shard reduce on the tiny (2, 8, 128) slab.
    return jnp.sum(partials) / jnp.float32(n)


def _reference(inputs, targets):
    """Pure-JAX reference mirroring the PyTorch forward (sanity check)."""
    x = inputs.astype(jnp.float32)
    t = targets.astype(jnp.float32)
    bce = POS_WEIGHT * t * jnp.logaddexp(-x, 0.0) + (1.0 - t) * jnp.logaddexp(x, 0.0)
    at = jnp.where(t > 0.5, 1.0 - ALPHA, ALPHA)
    pt = jnp.exp(-bce)
    return jnp.mean(at * (1.0 - pt) ** GAMMA * bce)


if __name__ == "__main__":
    key = jax.random.PRNGKey(0)
    k_x, k_t = jax.random.split(key)

    N = 1024  # small 1-D batch of logits/labels (module only broadcasts correctly for 1-D)
    inputs = jax.random.normal(k_x, (N,), dtype=jnp.float32) * 2.0
    targets = jax.random.bernoulli(k_t, p=0.3, shape=(N,)).astype(jnp.float32)

    # f32 path
    loss = jax.block_until_ready(weighted_focal_loss(inputs, targets))
    ref = jax.block_until_ready(_reference(inputs, targets))
    assert jnp.allclose(loss, ref, atol=1e-5, rtol=1e-5), (loss, ref)

    # bf16 streaming path (half the HBM bytes); compare on the same rounded values.
    x_bf16 = inputs.astype(jnp.bfloat16)
    t_bf16 = targets.astype(jnp.bfloat16)
    loss_bf16 = jax.block_until_ready(weighted_focal_loss(x_bf16, t_bf16))
    ref_bf16 = jax.block_until_ready(
        _reference(x_bf16.astype(jnp.float32), t_bf16.astype(jnp.float32)))
    assert jnp.allclose(loss_bf16, ref_bf16, atol=1e-5, rtol=1e-5), (loss_bf16, ref_bf16)

    # Non-multiple-of-128 length exercises the padding mask (padded lanes must not leak into the sum).
    N2 = 1000
    loss2 = jax.block_until_ready(weighted_focal_loss(inputs[:N2], targets[:N2]))
    ref2 = jax.block_until_ready(_reference(inputs[:N2], targets[:N2]))
    assert jnp.allclose(loss2, ref2, atol=1e-5, rtol=1e-5), (loss2, ref2)

    print("KERNEL_OK")
</pallas_src>

<mosaic_0001>
module attributes {stable_mosaic.version = 11 : i64} {
  func.func @kernel(%arg0: i32, %arg1: i32, %arg2: memref<32x128xf32, #tpu.memory_space<vmem>>, %arg3: memref<32x128xf32, #tpu.memory_space<vmem>>, %arg4: memref<1x8x128xf32, #tpu.memory_space<vmem>>) attributes {dimension_semantics = [#tpu.dimension_semantics<parallel>, #tpu.dimension_semantics<arbitrary>], iteration_bounds = array<i64: 2, 1>, scalar_prefetch = 0 : i64, scratch_operands = 0 : i64, tpu.core_type = #tpu.core_type<tc>, window_params = [{transform_indices = @transform_0, window_bounds = array<i64: 32, 128>}, {transform_indices = @transform_1, window_bounds = array<i64: 32, 128>}, {transform_indices = @transform_2, window_bounds = array<i64: 1, 8, 128>}]} {
    %c0_i32 = arith.constant 0 : i32
    %0 = arith.cmpi eq, %arg1, %c0_i32 : i32
    %1 = arith.extui %0 : i1 to i32
    %c0_i32_0 = arith.constant 0 : i32
    %2 = arith.cmpi ne, %1, %c0_i32_0 : i32
    scf.if %2 {
      %cst_20 = arith.constant 0.000000e+00 : f32
      %61 = vector.broadcast %cst_20 : f32 to vector<1x8x128xf32>
      %c0_21 = arith.constant 0 : index
      %c0_22 = arith.constant 0 : index
      %c0_23 = arith.constant 0 : index
      %62 = vector.load %arg4[%c0_21, %c0_22, %c0_23] : memref<1x8x128xf32, #tpu.memory_space<vmem>>, vector<1x8x128xf32>
      tpu.vector_store %arg4[%c0_21, %c0_22, %c0_23], %61 {strides = array<i32>} : memref<1x8x128xf32, #tpu.memory_space<vmem>>, vector<1x8x128xf32>,
    } else {
    }
    %c0 = arith.constant 0 : index
    %c0_1 = arith.constant 0 : index
    %3 = vector.load %arg2[%c0, %c0_1] : memref<32x128xf32, #tpu.memory_space<vmem>>, vector<32x128xf32>
    %c0_2 = arith.constant 0 : index
    %c0_3 = arith.constant 0 : index
    %4 = vector.load %arg3[%c0_2, %c0_3] : memref<32x128xf32, #tpu.memory_space<vmem>>, vector<32x128xf32>
    %cst = arith.constant 0.000000e+00 : f32
    %5 = vector.broadcast %cst : f32 to vector<32x128xf32>
    %6 = arith.subf %5, %3 : vector<32x128xf32>
    %cst_4 = arith.constant 0.000000e+00 : f32
    %7 = vector.broadcast %cst_4 : f32 to vector<32x128xf32>
    %8 = arith.maximumf %6, %7 : vector<32x128xf32>
    %9 = vector.broadcast %cst_4 : f32 to vector<32x128xf32>
    %10 = arith.subf %6, %9 : vector<32x128xf32>
    %11 = arith.cmpf one, %10, %10 : vector<32x128xf32>
    %12 = vector.broadcast %cst_4 : f32 to vector<32x128xf32>
    %13 = arith.addf %6, %12 : vector<32x128xf32>
    %14 = math.absf %10 : vector<32x128xf32>
    %cst_5 = arith.constant 0.000000e+00 : f32
    %15 = vector.broadcast %cst_5 : f32 to vector<32x128xf32>
    %16 = arith.subf %15, %14 : vector<32x128xf32>
    %17 = math.exp %16 : vector<32x128xf32>
    %18 = math.log1p %17 : vector<32x128xf32>
    %19 = arith.addf %8, %18 : vector<32x128xf32>
    %20 = arith.select %11, %13, %19 : vector<32x128xi1>, vector<32x128xf32>
    %21 = arith.addf %20, %3 : vector<32x128xf32>
    %cst_6 = arith.constant 2.000000e+00 : f32
    %22 = vector.broadcast %cst_6 : f32 to vector<32x128xf32>
    %23 = arith.mulf %22, %4 : vector<32x128xf32>
    %24 = arith.mulf %23, %20 : vector<32x128xf32>
    %cst_7 = arith.constant 1.000000e+00 : f32
    %25 = vector.broadcast %cst_7 : f32 to vector<32x128xf32>
    %26 = arith.subf %25, %4 : vector<32x128xf32>
    %27 = arith.mulf %26, %21 : vector<32x128xf32>
    %28 = arith.addf %24, %27 : vector<32x128xf32>
    %cst_8 = arith.constant 5.000000e-01 : f32
    %29 = vector.broadcast %cst_8 : f32 to vector<32x128xf32>
    %30 = arith.mulf %29, %4 : vector<32x128xf32>
    %cst_9 = arith.constant 2.500000e-01 : f32
    %31 = vector.broadcast %cst_9 : f32 to vector<32x128xf32>
    %32 = arith.addf %31, %30 : vector<32x128xf32>
    %cst_10 = arith.constant 0.000000e+00 : f32
    %33 = vector.broadcast %cst_10 : f32 to vector<32x128xf32>
    %34 = arith.subf %33, %28 : vector<32x128xf32>
    %35 = math.exp %34 : vector<32x128xf32>
    %cst_11 = arith.constant 1.000000e+00 : f32
    %36 = vector.broadcast %cst_11 : f32 to vector<32x128xf32>
    %37 = arith.subf %36, %35 : vector<32x128xf32>
    %38 = arith.mulf %37, %37 : vector<32x128xf32>
    %39 = arith.mulf %32, %38 : vector<32x128xf32>
    %40 = arith.mulf %39, %28 : vector<32x128xf32>
    %c1_i32 = arith.constant 1 : i32
    %41 = arith.muli %arg0, %c1_i32 : i32
    %42 = arith.addi %41, %arg1 : i32
    %c32_i32 = arith.constant 32 : i32
    %43 = arith.muli %42, %c32_i32 : i32
    %44 = tpu.iota {dimensions = array<i32: 0>} : vector<32x128xi32>
    %45 = vector.broadcast %43 : i32 to vector<32x128xi32>
    %46 = arith.addi %44, %45 : vector<32x128xi32>
    %47 = tpu.iota {dimensions = array<i32: 1>} : vector<32x128xi32>
    %c128_i32 = arith.constant 128 : i32
    %48 = vector.broadcast %c128_i32 : i32 to vector<32x128xi32>
    %49 = arith.muli %46, %48 : vector<32x128xi32>
    %50 = arith.addi %49, %47 : vector<32x128xi32>
    %c1024_i32 = arith.constant 1024 : i32
    %51 = vector.broadcast %c1024_i32 : i32 to vector<32x128xi32>
    %52 = arith.cmpi slt, %50, %51 : vector<32x128xi32>
    %cst_12 = arith.constant 0.000000e+00 : f32
    %53 = vector.broadcast %cst_12 : f32 to vector<32x128xf32>
    %54 = arith.select %52, %40, %53 : vector<32x128xi1>, vector<32x128xf32>
    %c0_13 = arith.constant 0 : index
    %c0_14 = arith.constant 0 : index
    %c0_15 = arith.constant 0 : index
    %55 = vector.load %arg4[%c0_13, %c0_14, %c0_15] : memref<1x8x128xf32, #tpu.memory_space<vmem>>, vector<1x8x128xf32>
    %56 = vector.shape_cast %54 : vector<32x128xf32> to vector<4x8x128xf32>
    %cst_16 = arith.constant dense<0.000000e+00> : vector<8x128xf32>
    %57 = vector.multi_reduction <add>, %56, %cst_16 [0] : vector<4x8x128xf32> to vector<8x128xf32>
    %58 = vector.shape_cast %57 : vector<8x128xf32> to vector<1x8x128xf32>
    %59 = arith.addf %55, %58 : vector<1x8x128xf32>
    %c0_17 = arith.constant 0 : index
    %c0_18 = arith.constant 0 : index
    %c0_19 = arith.constant 0 : index
    %60 = vector.load %arg4[%c0_17, %c0_18, %c0_19] : memref<1x8x128xf32, #tpu.memory_space<vmem>>, vector<1x8x128xf32>
    tpu.vector_store %arg4[%c0_17, %c0_18, %c0_19], %59 {strides = array<i32>} : memref<1x8x128xf32, #tpu.memory_space<vmem>>, vector<1x8x128xf32>,
    return
  }
  func.func @transform_0(%arg0: i32, %arg1: i32) -> (i32, i32) {
    %c1_i32 = arith.constant 1 : i32
    %0 = arith.muli %arg0, %c1_i32 : i32
    %1 = arith.addi %0, %arg1 : i32
    %c0_i32 = arith.constant 0 : i32
    %c0_i32_0 = arith.constant 0 : i32
    return %1, %c0_i32 : i32, i32
  }
  func.func @transform_1(%arg0: i32, %arg1: i32) -> (i32, i32) {
    %c1_i32 = arith.constant 1 : i32
    %0 = arith.muli %arg0, %c1_i32 : i32
    %1 = arith.addi %0, %arg1 : i32
    %c0_i32 = arith.constant 0 : i32
    %c0_i32_0 = arith.constant 0 : i32
    return %1, %c0_i32 : i32, i32
  }
  func.func @transform_2(%arg0: i32, %arg1: i32) -> (i32, i32, i32) {
    %c0_i32 = arith.constant 0 : i32
    %c0_i32_0 = arith.constant 0 : i32
    %c0_i32_1 = arith.constant 0 : i32
    return %arg0, %c0_i32, %c0_i32_0 : i32, i32, i32
  }
}

</mosaic_0001>

<bundles_post_ra>
// kernel: tpu_custom_call.1
= control target key start
LH: loop header
LB: loop body
LE: loop exit
PB: predicated region body
PF: predicated region fallthrough
CT: control target
= control target key end

     0   :  { %7 = vsyncpa [#allocation3], 0  ;;  %s1147_s0 = inlined_call_operand.hbm [shape: f32[64,128], index: 0, kind: input, shape index: {}]   ;;  %s1148_s1 = inlined_call_operand.hbm [shape: f32[64,128], index: 1, kind: input, shape index: {}]   ;;  %s1149_s2 = inlined_call_operand.hbm [shape: f32[2,8,128], index: 2, kind: output, shape index: {}]  }
   0x1   :  { %9 = vsyncpa [#allocation3 + $0x1], 0 }
   0x2   :  { %10 = vsyncpa [#allocation6], 0 }
   0x3   :  { %12 = vsyncpa [#allocation6 + $0x1], 0 }
   0x4   :  { %13 = vsyncpa [#allocation4], 0 }
   0x5   :  { %15 = vsyncpa [#allocation4 + $0x1], 0  ;;  %s809_s9 = smov 0   ;;  %s811_s10 = smov 0  }
   0x6   :  { %s813_s11 = smov 0   ;;  %s815_s12 = smov 0  }
   0x7   :  { %s817_s13 = smov 0   ;;  %s819_s14 = smov 0  }
   0x8 LB: > { %s526_s15 = sadd.s32 4294967295, %s787_s14   ;;  %s527_s16 = sadd.s32 4294967294, %s787_s14   ;;  %s787_s14 = sphi %s819_s14, %s21_s14   ;;  %s783_s13 = sphi %s817_s13, %s1171_s13   ;;  %s779_s12 = sphi %s815_s12, %s1170_s12   ;;  %s775_s11 = sphi %s813_s11, %s1169_s11   ;;  %s771_s10 = sphi %s811_s10, %s1168_s10   ;;  %s767_s9 = sphi %s809_s9, %s1167_s9  }
   0x9   : > { %s33_s17 = sadd.s32 1, %s783_s13  ;;  %s42_s18 = sadd.s32 1, %s775_s11 }
   0xa   : > { %p35_p0 = scmp.ge.s32.totalorder %s33_s17, 2  ;;  %p49_p1 = scmp.ne.s32.totalorder %s775_s11, %s771_s10 }
   0xb   : > { %p50_p2 = scmp.eq.s32.totalorder %s787_s14, 0  ;;  %p55_p3 = scmp.ne.s32.totalorder %s771_s10, %s767_s9 }
   0xc   : > { %s1173_s17 = smov (%p35_p0, %s33_s17), 0  ;;  %p56_p5 = scmp.eq.s32.totalorder %s526_s15, 0 }
   0xd   : > { %p850_p4 = por %p50_p2, %p49_p1  ;;  %s39_s20 = ssub.s32 %s783_s13, %s1173_s17 }
   0xe   : > { %p107_p6 = scmp.eq.s32.totalorder %s526_s15, 1  ;;  %p40_p7 = scmp.eq.s32.totalorder %s39_s20, 0 }
   0xf   : > { %p856_p8 = por %p56_p5, %p55_p3  ;;  %p113_p10 = scmp.eq.s32.totalorder %s527_s16, 1 }
  0x10   : > { %p860_p9 = por %p107_p6, %p49_p1  ;;  %p564_p13 = scmp.lt.s32.totalorder %s787_s14, 2 }
  0x11   : > { %s1153_s21 = scalar_select %p856_p8, 1, 0 }
  0x12   : > { %s1154_s22 = scalar_select %p860_p9, 1, 0 }
  0x13   : > { %s865_s23 = scalar_select %p40_p7, %s775_s11, %s42_s18  }
  0x14   : > { %p867_p11 = por %p113_p10, %p55_p3  ;;  %s874_s25 = sand.u32 1, %s775_s11  }
  0x15   : > { %s530_s26 = sshll.u32 %s874_s25, 5  ;;  %s545_s27 = sshll.u32 %s783_s13, 9 }
  0x16   : > { %s1155_s24 = scalar_select %p867_p11, 1, 0 }
  0x17   : > { %s883_s30 = scalar_lea.hbm %s1147_s0, %s545_s27  ;;  %s137_s3 = scalar_lea.vmem [#allocation2], %s530_s26 }
  0x18   : > { %s145_s4 = sshll.u32 %s137_s3, 4  ;;  %p891_p0 = pnand %p564_p13, %p850_p4  ;;  %s887_s4 = int_to_ptr.vmem [resolvable:$true] %s145_s4 }
  0x19   : > { %s134_s6 = scalar_lea.sflag [#allocation3], %s874_s25  ;;  %s641_s7 = scalar_lea.hbm %s883_s30, 512 }
  0x1a   : > { %p642_p2 = scmp.ne.s32.totalorder %s883_s30, %s641_s7  ;;  %p643_p3 = pneg %p891_p0 }
  0x1b   : > { %s646_s16 = scalar_lea.hbm %s1147_s0, 1024  ;;  %p647_p4 = scmp.lt.u32.totalorder %s883_s30, %s1147_s0 }
  0x1c   : > { %p644_p5 = pnand %p643_p3, %p642_p2  ;;  %p648_p7 = scmp.lt.u32.totalorder %s646_s16, %s641_s7 }
  0x1d   : > { %p650_p13 = scmp.lt.u32.totalorder %s641_s7, %s883_s30 }
  0x1e   : > { %p645_p6 = pneg %p644_p5  ;;  %p649_p10 = por %p648_p7, %p647_p4 }
  0x20   : > { %p651_p12 = por %p650_p13, %p649_p10 }
  0x22   : > { %p652_p1 = pnand %p651_p12, %p645_p6 }
  0x24   : > { %655 = shalt.err (!%p652_p1)
}
  0x25   : > { %s656_s20 = scalar_lea.vmem %s887_s4, 512  ;;  %s789_s28 = smov [#allocation2]  }
  0x26   : > { %p657_p2 = scmp.ne.s32.totalorder %s887_s4, %s656_s20  ;;  %s661_s29 = sshll.u32 %s789_s28, 4  ;;  %s662_s29 = int_to_ptr.vmem [resolvable:$false] %s661_s29 }
  0x27   : > { %s663_s3 = scalar_lea.vmem %s662_s29, 1024  ;;  %p664_p9 = scmp.lt.s32.totalorder %s887_s4, %s662_s29 }
  0x28   : > { %p659_p5 = pnand %p657_p2, %p643_p3  ;;  %p665_p4 = scmp.lt.s32.totalorder %s663_s3, %s656_s20 }
  0x2a   : > { %p660_p11 = pneg %p659_p5  ;;  %p666_p7 = por %p665_p4, %p664_p9 }
  0x2c   : > { %p667_p10 = pnand %p666_p7, %p660_p11 }
  0x2e   : > { %670 = shalt.err (!%p667_p10)
}
  0x2f   : > { %s790_s7 = smov 128   ;;  %s791_s8 = smov 8  }
  0x30   : > { %556 = dma.hbm_to_vmem [thread:$0]  (!%p891_p0), %s883_s30, 512, %s887_s4, %s134_s6, %s790_s7, %s790_s7, %s791_s8  }
  0x31   : > { %p175_p9 = scmp.lt.s32.totalorder %s787_s14, 3  ;;  %s933_s18 = scalar_lea.hbm %s1148_s1, %s545_s27 }
  0x32   : > { %p1157_p11 = scmp.ge.s32.totalorder %s787_s14, 1  ;;  %s159_s20 = scalar_lea.vmem [#allocation5], %s530_s26 }
  0x33   : > { %s167_s28 = sshll.u32 %s159_s20, 4  ;;  %s156_s30 = scalar_lea.sflag [#allocation6], %s874_s25  ;;  %s943_s28 = int_to_ptr.vmem [resolvable:$true] %s167_s28 }
  0x34   : > { %p937_p12 = pnand %p1157_p11, %p175_p9  ;;  %s671_s4 = scalar_lea.hbm %s933_s18, 512 }
  0x35   : > { %p672_p1 = scmp.ne.s32.totalorder %s933_s18, %s671_s4  ;;  %s676_s29 = scalar_lea.hbm %s1148_s1, 1024 }
  0x36   : > { %p677_p2 = scmp.lt.u32.totalorder %s933_s18, %s1148_s1  ;;  %p678_p5 = scmp.lt.u32.totalorder %s676_s29, %s671_s4 }
  0x37   : > { %p674_p6 = pnand %p672_p1, %p643_p3  ;;  %p680_p7 = scmp.lt.u32.totalorder %s671_s4, %s933_s18 }
  0x38   : > { %p679_p4 = por %p678_p5, %p677_p2 }
  0x39   : > { %p675_p13 = pneg %p674_p6 }
  0x3a   : > { %p681_p10 = por %p680_p7, %p679_p4 }
  0x3c   : > { %p682_p9 = pnand %p681_p10, %p675_p13 }
  0x3e   : > { %685 = shalt.err (!%p682_p9)
}
  0x3f   : > { %s686_s26 = scalar_lea.vmem %s943_s28, 512  ;;  %s792_s16 = smov [#allocation5]  }
  0x40   : > { %p687_p11 = scmp.ne.s32.totalorder %s943_s28, %s686_s26  ;;  %s691_s20 = sshll.u32 %s792_s16, 4  ;;  %s692_s20 = int_to_ptr.vmem [resolvable:$false] %s691_s20 }
  0x41   : > { %s693_s27 = scalar_lea.vmem %s692_s20, 1024  ;;  %p694_p8 = scmp.lt.s32.totalorder %s943_s28, %s692_s20 }
  0x42   : > { %p689_p1 = pnand %p687_p11, %p643_p3  ;;  %p695_p2 = scmp.lt.s32.totalorder %s693_s27, %s686_s26 }
  0x44   : > { %p690_p6 = pneg %p689_p1  ;;  %p696_p5 = por %p695_p2, %p694_p8 }
  0x46   : > { %p697_p4 = pnand %p696_p5, %p690_p6 }
  0x48   : > { %700 = shalt.err (!%p697_p4)
}
  0x49   : > { %559 = dma.hbm_to_vmem [thread:$0]  (!%p891_p0), %s933_s18, 512, %s943_s28, %s156_s30, %s790_s7, %s790_s7, %s791_s8  }
  0x4a   : > { %179 = sbr.rel (%p937_p12) target bundleno = 174 (0xae), region = 28  ;;  %s977_s4 = sand.u32 (!%p937_p12), 1, %s771_s10  }
  0x4b   : > { %s537_s6 = sshll.u32 (!%p937_p12), %s977_s4, 5  ;;  %s182_s29 = scalar_lea.sflag (!%p937_p12), [#allocation3], %s977_s4 }
  0x4c   : > { %s185_s5 = scalar_lea.vmem (!%p937_p12), [#allocation2], %s537_s6  ;;  %p1159_p8 = scmp.ne.s32.totalorder (!%p937_p12), %s1153_s21, 0 }
  0x51   : > { %754 = dma.done.wait (%p1159_p8), %s182_s29, 512  }
  0x52   : > { %756 = vsyncadd (%p1159_p8), %s182_s29, 4294966784  ;;  %s191_s25 = scalar_lea.sflag [#allocation6], %s977_s4  ;;  %s986_s7 = scalar_lea.vmem [#allocation5], %s537_s6 }
  0x53   : > { %758 = dma.done.wait (%p1159_p8), %s191_s25, 512  }
  0x54   : > { %760 = vsyncadd (%p1159_p8), %s191_s25, 4294966784  ;;  %v992_v0 = vld [vmem:[%s185_s5] sm:$0xff]  ;;  %v994_v1 = vld [vmem:[%s185_s5 + $0x8] sm:$0xff]  ;;  %s540_s21 = sshll.u32 %s779_s12, 5  ;;  %s539_s8 = sshll.u32 %s977_s4, 3 }
  0x55   : > { %v996_v2 = vld [vmem:[%s185_s5 + $0x10] sm:$0xff]  ;;  %v998_v3 = vld [vmem:[%s185_s5 + $0x18] sm:$0xff]  ;;  %v1001_v4 = vsub.f32 0.0, %v992_v0  ;;  %v1004_v5 = vsub.f32 0.0, %v994_v1  ;;  %v1017_v31 = vld [vmem:[%s986_s7] sm:$0xff]  ;;  %s542_s18 = sshll.u32 %s779_s12, 7 }
  0x56   : > { %v1007_v6 = vsub.f32 0.0, %v996_v2  ;;  %v1010_v7 = vsub.f32 0.0, %v998_v3  ;;  %v1020_v32 = vld [vmem:[%s986_s7 + $0x8] sm:$0xff]  ;;  %v317_v39 = vmul.f32 2.0, %v1017_v31  ;;  %v325_v43 = vsub.f32 1.0, %v1017_v31  ;;  %v1035_v53 = vld [vmem:[%s986_s7 + $0x10] sm:$0xff]  ;;  %s1098_s15 = scalar_lea.hbm %s1149_s2, %s542_s18 }
  0x57   : > { %v253_v8 = vand.u32 2147483647, %v1001_v4  ;;  %v254_v9 = vand.u32 2147483647, %v1004_v5  ;;  %v241_v40 = vmax.f32 %v1001_v4, 0.0  ;;  %v318_v42 = vmul.f32 2.0, %v1020_v32 }
  0x58   : > { %v255_v10 = vand.u32 2147483647, %v1007_v6  ;;  %v256_v11 = vand.u32 2147483647, %v1010_v7  ;;  %v242_v44 = vmax.f32 %v1004_v5, 0.0  ;;  %v243_v45 = vmax.f32 %v1007_v6, 0.0 }
  0x59   : > { %v257_v12 = vsub.f32 0.0, %v253_v8  ;;  %v258_v13 = vsub.f32 0.0, %v254_v9  ;;  %vm245_vm0 = vcmp.ne.f32.partialorder %v1001_v4, %v1001_v4  ;;  %v244_v54 = vmax.f32 %v1010_v7, 0.0  ;;  %v1043_v59 = vld [vmem:[%s986_s7 + $0x18] sm:$0xff]  ;;  %s219_s19 = scalar_lea.vmem [#allocation7], %s539_s8  ;;  %s410_s26 = scalar_lea.sflag [#allocation4], %s977_s4 }
  0x5a   : > { %v259_v14 = vsub.f32 0.0, %v255_v10  ;;  %v260_v15 = vsub.f32 0.0, %v256_v11  ;;  %vm246_vm3 = vcmp.ne.f32.partialorder %v1004_v5, %v1004_v5  ;;  %vm247_vm4 = vcmp.ne.f32.partialorder %v1007_v6, %v1007_v6  ;;  %s423_s28 = sshll.u32 %s219_s19, 4  ;;  %p1164_p3 = scmp.ne.s32.totalorder %s1154_s22, 0  ;;  %s1100_s28 = int_to_ptr.vmem [resolvable:$true] %s423_s28 }
  0x5b   : > { %v261_v16 = vmul.f32 1.442695, %v257_v12  ;;  %v263_v17 = vmul.f32 1.442695, %v258_v13  ;;  %vm248_vm6 = vcmp.ne.f32.partialorder %v1010_v7, %v1010_v7  ;;  %v319_v11 = vmul.f32 2.0, %v1035_v53  ;;  %s701_s16 = scalar_lea.vmem %s1100_s28, 128 }
  0x5c   : > { %v265_v18 = vmul.f32 1.442695, %v259_v14  ;;  %v267_v19 = vmul.f32 1.442695, %v260_v15  ;;  %v320_v15 = vmul.f32 2.0, %v1043_v59  ;;  %p702_p0 = scmp.ne.s32.totalorder %s1100_s28, %s701_s16  ;;  %s793_s12 = smov [#allocation7]  }
  0x5d   : > { %617 = vpow2.f32 %v261_v16  ;;  %s705_s20 = sshll.u32 %s793_s12, 4  ;;  %s706_s20 = int_to_ptr.vmem [resolvable:$false] %s705_s20 }
  0x5e   : > { %619 = vpow2.f32 %v263_v17  ;;  %p703_p12 = pnand %p702_p0, %p1164_p3  ;;  %s707_s27 = scalar_lea.vmem %s706_s20, 256 }
  0x5f   : > { %621 = vpow2.f32 %v265_v18  ;;  %v326_v18 = vsub.f32 1.0, %v1020_v32  ;;  %p708_p7 = scmp.lt.s32.totalorder %s1100_s28, %s706_s20  ;;  %p709_p10 = scmp.lt.s32.totalorder %s707_s27, %s701_s16 }
  0x60   : > { %623 = vpow2.f32 %v267_v19  ;;  %v327_v19 = vsub.f32 1.0, %v1035_v53  ;;  %p704_p13 = pneg %p703_p12 }
  0x61   : > { %p710_p9 = por %p709_p10, %p708_p7 }
  0x63   : > { %p711_p11 = pnand %p710_p9, %p704_p13 }
  0x67   : > { %v618_v20 = vpop.eup %617 }
  0x68   : > { %v620_v21 = vpop.eup %619  ;;  %v269_v22 = vadd.f32 1.0, %v618_v20  ;;  %v272_v27 = vmul.f32 -0.5, %v618_v20  ;;  %v275_v35 = vand.u32 2147483647, %v618_v20 }
  0x69   : > { %v622_v23 = vpop.eup %621  ;;  %v278_v24 = vadd.f32 1.0, %v620_v21  ;;  %v281_v28 = vmul.f32 -0.5, %v620_v21  ;;  %v284_v37 = vand.u32 2147483647, %v620_v21 }
  0x6a   : > { %v624_v25 = vpop.eup %623  ;;  %625 = vlog2.f32 %v269_v22  ;;  %v287_v26 = vadd.f32 1.0, %v622_v23  ;;  %v290_v30 = vmul.f32 -0.5, %v622_v23  ;;  %v273_v33 = vadd.f32 1.0, %v272_v27 }
  0x6b   : > { %627 = vlog2.f32 %v278_v24  ;;  %v296_v29 = vadd.f32 1.0, %v624_v25  ;;  %v299_v34 = vmul.f32 -0.5, %v624_v25  ;;  %v282_v36 = vadd.f32 1.0, %v281_v28 }
  0x6c   : > { %629 = vlog2.f32 %v287_v26  ;;  %v291_v38 = vadd.f32 1.0, %v290_v30  ;;  %v293_v41 = vand.u32 2147483647, %v622_v23  ;;  %v274_v46 = vmul.f32 %v618_v20, %v273_v33 }
  0x6d   : > { %631 = vlog2.f32 %v296_v29  ;;  %v300_v47 = vadd.f32 1.0, %v299_v34  ;;  %vm1030_vm1 = vcmp.lt.f32.partialorder %v275_v35, 0.0004427343  ;;  %v283_v50 = vmul.f32 %v620_v21, %v282_v36 }
  0x6e   : > { %v302_v51 = vand.u32 2147483647, %v624_v25  ;;  %vm1038_vm2 = vcmp.lt.f32.partialorder %v284_v37, 0.0004427343  ;;  %v292_v57 = vmul.f32 %v622_v23, %v291_v38  ;;  %vm294_vm5 = vcmp.lt.f32.partialorder %v293_v41, 0.0004427343 }
  0x6f   : > { %v301_v63 = vmul.f32 %v624_v25, %v300_v47  ;;  %v328_v29 = vsub.f32 1.0, %v1043_v59  ;;  %v375_v33 = vlaneseq }
  0x70   : > { %vm303_vm7 = vcmp.lt.f32.partialorder %v302_v51, 0.0004427343 }
  0x74   : > { %v626_v48 = vpop.eup %625 }
  0x75   : > { %v628_v52 = vpop.eup %627  ;;  %v271_v55 = vmul.f32 0.6931472, %v626_v48 }
  0x76   : > { %v630_v58 = vpop.eup %629  ;;  %v280_v60 = vmul.f32 0.6931472, %v628_v52 }
  0x77   : > { %v277_v61 = vsel %vm1030_vm1, %v274_v46, %v271_v55  ;;  %v289_v62 = vmul.f32 0.6931472, %v630_v58  ;;  %v632_v8 = vpop.eup %631  ;;  %v380_v46 = vstv %s540_s21  ;;  %v338_v55 = vmul.f32 0.5, %v1020_v32 }
  0x78   : > { %v286_v9 = vsel %vm1038_vm2, %v283_v50, %v280_v60  ;;  %v305_v10 = vadd.f32 %v277_v61, %v241_v40  ;;  %v298_v13 = vmul.f32 0.6931472, %v632_v8  ;;  %v376_v40 = vshrl.u32 %v375_v33, 7 }
  0x79   : > { %v295_v12 = vsel %vm294_vm5, %v292_v57, %v289_v62  ;;  %v306_v14 = vadd.f32 %v286_v9, %v242_v44  ;;  %v386_v57 = vand.u32 127, %v375_v33  ;;  %v339_v60 = vmul.f32 0.5, %v1035_v53 }
  0x7a   : > { %v307_v16 = vadd.f32 %v295_v12, %v243_v45  ;;  %v309_v17 = vsel %vm245_vm0, %v1001_v4, %v305_v10  ;;  %v304_v20 = vsel %vm303_vm7, %v301_v63, %v298_v13  ;;  %v377_v45 = vadd.s32 8, %v376_v40 }
  0x7b   : > { %v310_v21 = vsel %vm246_vm3, %v1004_v5, %v306_v14  ;;  %v313_v22 = vadd.f32 %v309_v17, %v992_v0  ;;  %v321_v23 = vmul.f32 %v317_v39, %v309_v17  ;;  %v308_v24 = vadd.f32 %v304_v20, %v244_v54 }
  0x7c   : > { %v311_v25 = vsel %vm247_vm4, %v1007_v6, %v307_v16  ;;  %v314_v4 = vadd.f32 %v310_v21, %v994_v1  ;;  %v322_v26 = vmul.f32 %v318_v42, %v310_v21  ;;  %v378_v48 = vadd.s32 16, %v376_v40 }
  0x7d   : > { %v315_v27 = vadd.f32 %v311_v25, %v996_v2  ;;  %v323_v28 = vmul.f32 %v319_v11, %v311_v25  ;;  %v329_v30 = vmul.f32 %v325_v43, %v313_v22  ;;  %v312_v0 = vsel %vm248_vm6, %v1010_v7, %v308_v24 }
  0x7e   : > { %v330_v5 = vmul.f32 %v326_v18, %v314_v4  ;;  %v316_v34 = vadd.f32 %v312_v0, %v998_v3  ;;  %v324_v6 = vmul.f32 %v320_v15, %v312_v0  ;;  %v379_v49 = vadd.s32 24, %v376_v40 }
  0x7f   : > { %v331_v35 = vmul.f32 %v327_v19, %v315_v27  ;;  %v333_v1 = vadd.f32 %v329_v30, %v321_v23  ;;  %v381_v50 = vadd.s32 %v380_v46, %v376_v40  ;;  %v382_v51 = vadd.s32 %v380_v46, %v377_v45 }
  0x80   : > { %v334_v36 = vadd.f32 %v330_v5, %v322_v26  ;;  %v332_v37 = vmul.f32 %v328_v29, %v316_v34  ;;  %v383_v52 = vadd.s32 %v380_v46, %v378_v48  ;;  %v337_v54 = vmul.f32 0.5, %v1017_v31 }
  0x81   : > { %v1080_v2 = vadd.f32 %v331_v35, %v323_v28  ;;  %v345_v38 = vsub.f32 0.0, %v333_v1  ;;  %v384_v56 = vadd.s32 %v380_v46, %v379_v49  ;;  %v387_v58 = vmul.u32 128, %v381_v50 }
  0x82   : > { %v346_v39 = vsub.f32 0.0, %v334_v36  ;;  %v1082_v41 = vadd.f32 %v332_v37, %v324_v6  ;;  %v388_v61 = vmul.u32 128, %v382_v51  ;;  %v389_v63 = vmul.u32 128, %v383_v52 }
  0x83   : > { %v347_v42 = vsub.f32 0.0, %v1080_v2  ;;  %v349_v7 = vmul.f32 1.442695, %v345_v38  ;;  %v340_v9 = vmul.f32 0.5, %v1043_v59  ;;  %v341_v10 = vadd.f32 0.25, %v337_v54 }
  0x84   : > { %v351_v43 = vmul.f32 1.442695, %v346_v39  ;;  %v348_v44 = vsub.f32 0.0, %v1082_v41  ;;  %v342_v13 = vadd.f32 0.25, %v338_v55  ;;  %v390_v15 = vmul.u32 128, %v384_v56 }
  0x85   : > { %633 = vpow2.f32 %v349_v7  ;;  %v353_v3 = vmul.f32 1.442695, %v347_v42  ;;  %v391_v31 = vadd.s32 %v387_v58, %v386_v57  ;;  %v343_v16 = vadd.f32 0.25, %v339_v60 }
  0x86   : > { %635 = vpow2.f32 %v351_v43  ;;  %v355_v47 = vmul.f32 1.442695, %v348_v44  ;;  %v392_v18 = vadd.s32 %v388_v61, %v386_v57  ;;  %v393_v20 = vadd.s32 %v389_v63, %v386_v57 }
  0x87   : > { %637 = vpow2.f32 %v353_v3  ;;  %v344_v21 = vadd.f32 0.25, %v340_v9  ;;  %v394_v25 = vadd.s32 %v390_v15, %v386_v57  ;;  %vm395_vm8 = vcmp.lt.s32.totalorder %v391_v31, 1024 }
  0x88   : > { %639 = vpow2.f32 %v355_v47  ;;  %vm396_vm9 = vcmp.lt.s32.totalorder %v392_v18, 1024  ;;  %vm397_vm10 = vcmp.lt.s32.totalorder %v393_v20, 1024 }
  0x89   : > { %vm398_vm11 = vcmp.lt.s32.totalorder %v394_v25, 1024 }
  0x8f   : > { %v634_v62 = vpop.eup %633 }
  0x90   : > { %v636_v8 = vpop.eup %635  ;;  %v357_v11 = vsub.f32 1.0, %v634_v62 }
  0x91   : > { %v638_v12 = vpop.eup %637  ;;  %v358_v14 = vsub.f32 1.0, %v636_v8 }
  0x92   : > { %v359_v32 = vsub.f32 1.0, %v638_v12  ;;  %v361_v17 = vmul.f32 %v357_v11, %v357_v11  ;;  %v640_v19 = vpop.eup %639 }
  0x93   : > { %v362_v53 = vmul.f32 %v358_v14, %v358_v14  ;;  %v360_v22 = vsub.f32 1.0, %v640_v19 }
  0x94   : > { %v363_v23 = vmul.f32 %v359_v32, %v359_v32  ;;  %v365_v24 = vmul.f32 %v361_v17, %v341_v10 }
  0x95   : > { %v366_v59 = vmul.f32 %v362_v53, %v342_v13  ;;  %v364_v4 = vmul.f32 %v360_v22, %v360_v22 }
  0x96   : > { %v367_v26 = vmul.f32 %v363_v23, %v343_v16  ;;  %v369_v27 = vmul.f32 %v365_v24, %v333_v1 }
  0x97   : > { %v370_v28 = vmul.f32 %v366_v59, %v334_v36  ;;  %v368_v29 = vmul.f32 %v364_v4, %v344_v21 }
  0x98   : > { %v371_v30 = vmul.f32 %v367_v26, %v1080_v2  ;;  %v399_v0 = vsel %vm395_vm8, %v369_v27, 0.0 }
  0x99   : > { %v400_v5 = vsel %vm396_vm9, %v370_v28, 0.0  ;;  %v372_v33 = vmul.f32 %v368_v29, %v1082_v41 }
  0x9a   : > { %v401_v34 = vsel %vm397_vm10, %v371_v30, 0.0  ;;  %v404_v6 = vadd.f32 %v400_v5, %v399_v0 }
  0x9b   : > { %v402_v35 = vsel %vm398_vm11, %v372_v33, 0.0 }
  0x9c   : > { %v405_v37 = vadd.f32 %v404_v6, %v401_v34 }
  0x9e   : > { %v406_v1 = vadd.f32 %v405_v37, %v402_v35 }
  0xa0   : > { %408 = vst [vmem:[%s219_s19] sm:$0xff] %v406_v1 }
  0xa1   : > { %714 = shalt.err (!%p711_p11)
}
  0xa2   : > { %s715_s4 = scalar_lea.hbm %s1098_s15, 128  ;;  %s719_s5 = scalar_lea.hbm %s1149_s2, 256 }
  0xa3   : > { %p716_p1 = scmp.ne.s32.totalorder %s1098_s15, %s715_s4  ;;  %p720_p5 = scmp.lt.u32.totalorder %s1098_s15, %s1149_s2 }
  0xa4   : > { %p721_p4 = scmp.lt.u32.totalorder %s719_s5, %s715_s4  ;;  %p723_p0 = scmp.lt.u32.totalorder %s715_s4, %s1098_s15 }
  0xa5   : > { %p717_p6 = pnand %p716_p1, %p1164_p3 }
  0xa6   : > { %p722_p8 = por %p721_p4, %p720_p5 }
  0xa7   : > { %p718_p2 = pneg %p717_p6 }
  0xa8   : > { %p724_p12 = por %p723_p0, %p722_p8 }
  0xaa   : > { %p725_p13 = pnand %p724_p12, %p718_p2 }
  0xac   : > { %728 = shalt.err (!%p725_p13)
}
  0xad   : > { %551 = dma.vmem_to_hbm [thread:$0]  (%p1164_p3), %s1100_s28, 128, %s1098_s15, %s410_s26  }
  0xae PF: > { %s435_s21 = sand.u32 1, %s767_s9   ;;  %p1165_p7 = scmp.ne.s32.totalorder %s1155_s24, 0 }
  0xaf   : > { %p1166_p10 = scmp.ge.s32.totalorder %s787_s14, 2  ;;  %s436_s8 = scalar_lea.sflag [#allocation4], %s435_s21 }
  0xb1   : > { %p561_p9 = pnand %p1166_p10, %p1165_p7 }
  0xb3   : > { %762 = dma.done.wait (!%p561_p9), %s436_s8, 128  }
  0xb4   : > { %764 = vsyncadd (!%p561_p9), %s436_s8, 4294967168  ;;  %s21_s14 = sadd.s32 1, %s787_s14   ;;  %s1167_s9 = smov %s771_s10 }
  0xb5   : > { %p18_p11 = scmp.ge.s32.totalorder %s21_s14, 4   ;;  %s1168_s10 = smov %s775_s11 }
  0xb6   : > { %s1169_s11 = smov %s865_s23  ;;  %s1170_s12 = smov %s783_s13 }
  0xb7   : > { %s1171_s13 = smov %s1173_s17  ;;  %20 = sbr.rel (!%p18_p11) target bundleno = 8 (0x8), region = 90 }
  0xbe   :  { %441 = vsyncpa [#allocation3], 1 }
  0xbf   :  { %443 = vsyncpa [#allocation3 + $0x1], 1 }
  0xc0   :  { %444 = vsyncpa [#allocation6], 1 }
  0xc1   :  { %446 = vsyncpa [#allocation6 + $0x1], 1 }
  0xc2   :  { %447 = vsyncpa [#allocation4], 1 }
  0xc3   :  { %449 = vsyncpa [#allocation4 + $0x1], 1 }

</bundles_post_ra>
